<compile_context>
chip_gen: v7x
topology: tpu7x:2x2x1
jax: 0.10.0
libtpu: 0.0.40
codegen_flags: <defaults>
</compile_context>

<pallas_src>
from functools import partial

import jax
import jax.numpy as jnp
import numpy as np
from jax.experimental import pallas as pl
from jax.experimental.pallas import tpu as pltpu

EPS = 1e-5                         # PyTorch nn.LayerNorm default eps
VMEM_LIMIT = 48 * 1024 * 1024      # <= v7x's 64 MiB physical; fine on v5e/v6e


def _round_up(x, m):
    return ((x + m - 1) // m) * m


# ---------------------------------------------------------------------------
# Kernel 1: edge-message MLP + block-local scatter_sum
#   grid = (node_blocks, edge_tiles_per_block); every edge tile only contains
#   edges whose target node lives inside node block `b` (wrapper guarantees it).
# ---------------------------------------------------------------------------
def edge_kernel(hE_ref, src_ref, W1_ref, W2_ref, W3_ref, vecs_ref, dh_ref):
    t = pl.program_id(1)
    n_tile = dh_ref.shape[0]
    e_tile = hE_ref.shape[0]

    b1 = vecs_ref[0:1, :]
    b2 = vecs_ref[1:2, :]
    b3 = vecs_ref[2:3, :]          # already pre-scaled by 1/scale

    @pl.when(t == 0)
    def _init():
        dh_ref[...] = jnp.zeros_like(dh_ref)

    # W3(ReLU(W2(ReLU(W1(h_E))))) — bf16 MXU operands, f32 accumulation.
    hE = hE_ref[...]                                                   # bf16 [e_tile, Fin_pad]
    m = jnp.dot(hE, W1_ref[...], preferred_element_type=jnp.float32) + b1
    m = jnp.maximum(m, 0.0)
    m = jnp.dot(m.astype(jnp.bfloat16), W2_ref[...],
                preferred_element_type=jnp.float32) + b2
    m = jnp.maximum(m, 0.0)
    m = jnp.dot(m.astype(jnp.bfloat16), W3_ref[...],
                preferred_element_type=jnp.float32) + b3               # [e_tile, H_pad]

    # Bounded one-hot scatter (node-tile sized): src holds block-LOCAL node
    # indices; sentinel -1 for padded edges gives an all-zero onehot column.
    node_ids = jax.lax.broadcasted_iota(jnp.int32, (n_tile, e_tile), 0)
    onehot = (node_ids == src_ref[...]).astype(jnp.bfloat16)           # [n_tile, e_tile]
    dh_ref[...] += jnp.dot(onehot, m.astype(jnp.bfloat16),
                           preferred_element_type=jnp.float32)

    # TODO(synk): dropout is identity here (eval mode); training-mode dropout
    # would build a mask with pltpu.prng_seed / pltpu.prng_random_bits in-kernel.


# ---------------------------------------------------------------------------
# Kernel 2: node update — residual + LayerNorm1 + FFN + LayerNorm2, node-tiled.
# ---------------------------------------------------------------------------
def node_kernel(hV_ref, dh_ref, W4_ref, W5_ref, vecs_ref, b4_ref, out_ref, *, h_true):
    n_tile, h_pad = out_ref.shape
    inv_h = 1.0 / h_true
    lane = jax.lax.broadcasted_iota(jnp.int32, (n_tile, h_pad), 1)
    mask = (lane < h_true).astype(jnp.float32)

    b5 = vecs_ref[3:4, :]
    g1 = vecs_ref[4:5, :]
    be1 = vecs_ref[5:6, :]
    g2 = vecs_ref[6:7, :]
    be2 = vecs_ref[7:8, :]

    # residual + LayerNorm1 over the true H lanes (padded lanes are 0)
    x = hV_ref[...] + dh_ref[...]
    mu = jnp.sum(x, axis=-1, keepdims=True) * inv_h
    xc = (x - mu) * mask
    var = jnp.sum(xc * xc, axis=-1, keepdims=True) * inv_h
    x = xc * jax.lax.rsqrt(var + EPS) * g1 + be1        # padded lanes stay 0 (g/b pad = 0)

    # position-wise FFN: Linear(H, 4H) -> ReLU -> Linear(4H, H)
    d = jnp.dot(x.astype(jnp.bfloat16), W4_ref[...],
                preferred_element_type=jnp.float32) + b4_ref[...]
    d = jnp.maximum(d, 0.0)
    d = jnp.dot(d.astype(jnp.bfloat16), W5_ref[...],
                preferred_element_type=jnp.float32) + b5

    # residual + LayerNorm2
    y = x + d
    mu2 = jnp.sum(y, axis=-1, keepdims=True) * inv_h
    yc = (y - mu2) * mask
    var2 = jnp.sum(yc * yc, axis=-1, keepdims=True) * inv_h
    out_ref[...] = (yc * jax.lax.rsqrt(var2 + EPS) * g2 + be2).astype(out_ref.dtype)


def mpnn_block(h_V, h_E, edge_idx, params, scale=30.0, e_tile=2048, n_tile=256):
    """Pads features to lane-dense widths, buckets edges by node block
    (sorted by src, host-side numpy -> call with concrete edge_idx), then runs
    (1) the edge-tiled message/scatter kernel and (2) the node-tiled update."""
    N, H = h_V.shape
    E, Fin = h_E.shape
    f32, bf16 = jnp.float32, jnp.bfloat16
    inv_scale = 1.0 / float(scale)

    H_pad = _round_up(H, 128)
    Fin_pad = _round_up(Fin, 128)
    F4_pad = _round_up(4 * H, 128)

    # ---- node blocking ------------------------------------------------------
    n_tile = max(8, min(_round_up(n_tile, 8), _round_up(N, 8)))
    N_pad = _round_up(N, n_tile)
    n_blocks = N_pad // n_tile

    # ---- bucket edges by node block (host-side; edge_idx must be concrete) --
    src_np = np.asarray(edge_idx)[0].astype(np.int64)                  # [E]
    order = np.argsort(src_np, kind="stable")
    src_sorted = src_np[order]
    blk_of_edge = src_sorted // n_tile
    counts = np.bincount(blk_of_edge, minlength=n_blocks).astype(np.int64)

    max_cnt = int(counts.max())
    e_tile = max(128, min(_round_up(e_tile, 128), _round_up(max(max_cnt, 1), 128)))
    t_max = max(1, -(-max(max_cnt, 1) // e_tile))     # edge tiles per node block
    slot_cap = t_max * e_tile
    E_tot = n_blocks * slot_cap

    starts = np.zeros(n_blocks, dtype=np.int64)
    if n_blocks > 1:
        starts[1:] = np.cumsum(counts)[:-1]
    dest = (blk_of_edge * slot_cap
            + (np.arange(E, dtype=np.int64) - starts[blk_of_edge])).astype(np.int32)

    src_local = np.full((E_tot,), -1, np.int32)
    src_local[dest] = (src_sorted - blk_of_edge * n_tile).astype(np.int32)
    src_local = jnp.asarray(src_local).reshape(1, E_tot)

    hE_p = jnp.zeros((E_tot, Fin_pad), bf16)
    if E > 0:
        hE_sorted = jnp.asarray(h_E, f32)[jnp.asarray(order.astype(np.int32))]
        hE_p = hE_p.at[jnp.asarray(dest), :Fin].set(hE_sorted.astype(bf16))

    hV_p = jnp.zeros((N_pad, H_pad), f32).at[:N, :H].set(jnp.asarray(h_V, f32))

    # ---- pack weights (bf16, zero-padded) and vector bank (f32) -------------
    def pad_w(W, rp, cp, pre=1.0):
        W = jnp.asarray(W, f32) * pre
        r, c = W.shape
        return jnp.zeros((rp, cp), bf16).at[:r, :c].set(W.astype(bf16))

    W1 = pad_w(params["W1t"], Fin_pad, H_pad)
    W2 = pad_w(params["W2t"], H_pad, H_pad)
    W3 = pad_w(params["W3t"], H_pad, H_pad, pre=inv_scale)     # fold 1/scale
    W4 = pad_w(params["W4t"], H_pad, F4_pad)
    W5 = pad_w(params["W5t"], F4_pad, H_pad)

    def pad_v(v, width, pre=1.0):
        v = jnp.asarray(v, f32).reshape(-1) * pre
        return jnp.zeros((width,), f32).at[: v.shape[0]].set(v)

    vecs = jnp.stack([
        pad_v(params["b1"], H_pad),
        pad_v(params["b2"], H_pad),
        pad_v(params["b3"], H_pad, pre=inv_scale),
        pad_v(params["b5"], H_pad),
        pad_v(params["g1"], H_pad),
        pad_v(params["be1"], H_pad),
        pad_v(params["g2"], H_pad),
        pad_v(params["be2"], H_pad),
    ])                                                         # [8, H_pad]
    b4 = pad_v(params["b4"], F4_pad).reshape(1, F4_pad)

    # TODO(synk): mark the constant-index blocks pipeline_mode=pl.Buffered(1)
    # (single-buffered resident weights) once that knob is stable in this pin.
    def const2(shape):
        return pl.BlockSpec(shape, lambda b, t: (0, 0))

    # ---- phase 1: edge messages + block-local scatter ------------------------
    dh = pl.pallas_call(
        edge_kernel,
        out_shape=jax.ShapeDtypeStruct((N_pad, H_pad), jnp.float32),
        grid_spec=pltpu.PrefetchScalarGridSpec(
            num_scalar_prefetch=0,
            grid=(n_blocks, t_max),
            in_specs=[
                pl.BlockSpec((e_tile, Fin_pad), lambda b, t: (b * t_max + t, 0)),  # h_E
                pl.BlockSpec((1, e_tile),       lambda b, t: (0, b * t_max + t)),  # local src
                const2((Fin_pad, H_pad)),                                          # W1
                const2((H_pad, H_pad)),                                            # W2
                const2((H_pad, H_pad)),                                            # W3 (pre-scaled)
                const2((8, H_pad)),                                                # bias bank
            ],
            out_specs=pl.BlockSpec((n_tile, H_pad), lambda b, t: (b, 0)),
        ),
        compiler_params=pltpu.CompilerParams(
            dimension_semantics=("parallel", "arbitrary"),
            vmem_limit_bytes=VMEM_LIMIT,
        ),
    )(hE_p, src_local, W1, W2, W3, vecs)

    # ---- phase 2: node-tiled residual + LN + FFN + LN ------------------------
    def const1(shape):
        return pl.BlockSpec(shape, lambda i: (0, 0))

    out = pl.pallas_call(
        partial(node_kernel, h_true=H),
        out_shape=jax.ShapeDtypeStruct((N_pad, H_pad), jnp.float32),
        grid_spec=pltpu.PrefetchScalarGridSpec(
            num_scalar_prefetch=0,
            grid=(n_blocks,),
            in_specs=[
                pl.BlockSpec((n_tile, H_pad), lambda i: (i, 0)),   # h_V
                pl.BlockSpec((n_tile, H_pad), lambda i: (i, 0)),   # dh
                const1((H_pad, F4_pad)),                           # W4
                const1((F4_pad, H_pad)),                           # W5
                const1((8, H_pad)),                                # vector bank
                const1((1, F4_pad)),                               # b4
            ],
            out_specs=pl.BlockSpec((n_tile, H_pad), lambda i: (i, 0)),
        ),
        compiler_params=pltpu.CompilerParams(
            dimension_semantics=("parallel",),
            vmem_limit_bytes=VMEM_LIMIT,
        ),
    )(hV_p, dh, W4, W5, vecs, b4)

    return out[:N, :H]


def init_params(key, H, H_in):
    """Deterministic synthetic parameters matching the PyTorch module's shapes."""
    ks = jax.random.split(key, 5)

    def linear(k, fin, fout):
        kw, kb = jax.random.split(k)
        W = jax.random.normal(kw, (fout, fin), jnp.float32) / np.sqrt(fin)  # torch [out, in]
        b = jax.random.normal(kb, (fout,), jnp.float32) * 0.01
        return W.T, b                                                       # pre-transposed [in, out]

    W1t, b1 = linear(ks[0], H + H_in, H)
    W2t, b2 = linear(ks[1], H, H)
    W3t, b3 = linear(ks[2], H, H)
    W4t, b4 = linear(ks[3], H, 4 * H)
    W5t, b5 = linear(ks[4], 4 * H, H)
    return dict(
        W1t=W1t, b1=b1, W2t=W2t, b2=b2, W3t=W3t, b3=b3,
        W4t=W4t, b4=b4, W5t=W5t, b5=b5,
        g1=jnp.ones((H,), jnp.float32), be1=jnp.zeros((H,), jnp.float32),
        g2=jnp.ones((H,), jnp.float32), be2=jnp.zeros((H,), jnp.float32),
    )


def reference(h_V, h_E, edge_idx, p, scale=30.0):
    """Pure-JAX reference for the PyTorch forward (eval-mode dropout = identity).
    Matmul operands are cast to bf16 (f32 accumulation) to mirror the kernel's
    MXU precision; all other math is f32, matching the kernel."""
    f32, bf16 = jnp.float32, jnp.bfloat16
    inv_scale = 1.0 / scale

    def mm(a, w):
        return jnp.dot(a.astype(bf16), w.astype(bf16), preferred_element_type=f32)

    m = jnp.maximum(mm(h_E, p["W1t"]) + p["b1"], 0.0)
    m = jnp.maximum(mm(m, p["W2t"]) + p["b2"], 0.0)
    m = mm(m, p["W3t"] * inv_scale) + p["b3"] * inv_scale
    m = m.astype(bf16).astype(f32)                      # mirror bf16 scatter operand
    dh = jax.ops.segment_sum(m, edge_idx[0], num_segments=h_V.shape[0])

    def ln(x, g, b):
        mu = x.mean(-1, keepdims=True)
        var = ((x - mu) ** 2).mean(-1, keepdims=True)
        return (x - mu) * jax.lax.rsqrt(var + EPS) * g + b

    x = ln(h_V + dh, p["g1"], p["be1"])
    d = jnp.maximum(mm(x, p["W4t"]) + p["b4"], 0.0)
    d = mm(d, p["W5t"]) + p["b5"]
    return ln(x + d, p["g2"], p["be2"])


if __name__ == "__main__":
    key = jax.random.PRNGKey(0)

    def run_case(k, N, E, H, H_in, e_tile, n_tile):
        k_v, k_e, k_idx, k_par = jax.random.split(k, 4)
        h_V = jax.random.normal(k_v, (N, H), jnp.float32)
        h_E = jax.random.normal(k_e, (E, H + H_in), jnp.float32)
        # edge_idx[0] = src (scatter target node), edge_idx[1] = dst (unused by forward)
        edge_idx = jax.random.randint(k_idx, (2, E), 0, N, jnp.int32)
        params = init_params(k_par, H, H_in)

        out = jax.block_until_ready(
            mpnn_block(h_V, h_E, edge_idx, params, scale=30.0,
                       e_tile=e_tile, n_tile=n_tile))
        ref = jax.block_until_ready(reference(h_V, h_E, edge_idx, params, scale=30.0))
        np.testing.assert_allclose(np.asarray(out), np.asarray(ref), rtol=5e-3, atol=5e-3)

    k1, k2 = jax.random.split(key)
    # tiny spec-size case: 1 node block, 1 edge tile
    run_case(k1, N=8, E=16, H=32, H_in=32, e_tile=2048, n_tile=256)
    # 2 node blocks (parallel axis), multiple edge tiles per block (accumulation)
    run_case(k2, N=64, E=512, H=32, H_in=32, e_tile=128, n_tile=32)

    print("KERNEL_OK")
</pallas_src>

<mosaic_0001>
module attributes {stable_mosaic.version = 11 : i64} {
  func.func @edge_kernel(%arg0: i32, %arg1: i32, %arg2: memref<128x128xbf16, #tpu.memory_space<vmem>>, %arg3: memref<1x128xi32, #tpu.memory_space<vmem>>, %arg4: memref<128x128xbf16, #tpu.memory_space<vmem>>, %arg5: memref<128x128xbf16, #tpu.memory_space<vmem>>, %arg6: memref<128x128xbf16, #tpu.memory_space<vmem>>, %arg7: memref<8x128xf32, #tpu.memory_space<vmem>>, %arg8: memref<8x128xf32, #tpu.memory_space<vmem>>) attributes {dimension_semantics = [#tpu.dimension_semantics<parallel>, #tpu.dimension_semantics<arbitrary>], iteration_bounds = array<i64: 1, 1>, scalar_prefetch = 0 : i64, scratch_operands = 0 : i64, tpu.core_type = #tpu.core_type<tc>, window_params = [{transform_indices = @transform_0, window_bounds = array<i64: 128, 128>}, {transform_indices = @transform_1, window_bounds = array<i64: 1, 128>}, {pipeline_mode = #tpu.pipeline_mode<synchronous>, transform_indices = @transform_2, window_bounds = array<i64: 128, 128>}, {pipeline_mode = #tpu.pipeline_mode<synchronous>, transform_indices = @transform_3, window_bounds = array<i64: 128, 128>}, {pipeline_mode = #tpu.pipeline_mode<synchronous>, transform_indices = @transform_4, window_bounds = array<i64: 128, 128>}, {pipeline_mode = #tpu.pipeline_mode<synchronous>, transform_indices = @transform_5, window_bounds = array<i64: 8, 128>}, {transform_indices = @transform_6, window_bounds = array<i64: 8, 128>}]} {
    %c0 = arith.constant 0 : index
    %c0_0 = arith.constant 0 : index
    %0 = vector.load %arg7[%c0, %c0_0] : memref<8x128xf32, #tpu.memory_space<vmem>>, vector<1x128xf32>
    %c1 = arith.constant 1 : index
    %c0_1 = arith.constant 0 : index
    %1 = vector.load %arg7[%c1, %c0_1] : memref<8x128xf32, #tpu.memory_space<vmem>>, vector<1x128xf32>
    %c2 = arith.constant 2 : index
    %c0_2 = arith.constant 0 : index
    %2 = vector.load %arg7[%c2, %c0_2] : memref<8x128xf32, #tpu.memory_space<vmem>>, vector<1x128xf32>
    %c0_i32 = arith.constant 0 : i32
    %3 = arith.cmpi eq, %arg1, %c0_i32 : i32
    %4 = arith.extui %3 : i1 to i32
    %c0_i32_3 = arith.constant 0 : i32
    %5 = arith.cmpi ne, %4, %c0_i32_3 : i32
    scf.if %5 {
      %cst_23 = arith.constant 0.000000e+00 : f32
      %37 = vector.broadcast %cst_23 : f32 to vector<8x128xf32>
      %c0_24 = arith.constant 0 : index
      %c0_25 = arith.constant 0 : index
      %38 = vector.load %arg8[%c0_24, %c0_25] : memref<8x128xf32, #tpu.memory_space<vmem>>, vector<8x128xf32>
      tpu.vector_store %arg8[%c0_24, %c0_25], %37 {strides = array<i32>} : memref<8x128xf32, #tpu.memory_space<vmem>>, vector<8x128xf32>,
    } else {
    }
    %c0_4 = arith.constant 0 : index
    %c0_5 = arith.constant 0 : index
    %6 = vector.load %arg2[%c0_4, %c0_5] : memref<128x128xbf16, #tpu.memory_space<vmem>>, vector<128x128xbf16>
    %c0_6 = arith.constant 0 : index
    %c0_7 = arith.constant 0 : index
    %7 = vector.load %arg4[%c0_6, %c0_7] : memref<128x128xbf16, #tpu.memory_space<vmem>>, vector<128x128xbf16>
    %cst = arith.constant dense<0.000000e+00> : vector<128x128xf32>
    %8 = tpu.matmul %6, %7, %cst {dimension_numbers = #tpu.dot_dimension_numbers<[1], [0], [0], [1], [0, 0, 1, 1], [], []>} : vector<128x128xbf16>, vector<128x128xbf16>, vector<128x128xf32> -> vector<128x128xf32>
    %9 = vector.broadcast %0 : vector<1x128xf32> to vector<128x128xf32>
    %10 = arith.addf %8, %9 : vector<128x128xf32>
    %cst_8 = arith.constant 0.000000e+00 : f32
    %11 = vector.broadcast %cst_8 : f32 to vector<128x128xf32>
    %12 = arith.maximumf %10, %11 : vector<128x128xf32>
    %13 = arith.truncf %12 : vector<128x128xf32> to vector<128x128xbf16>
    %c0_9 = arith.constant 0 : index
    %c0_10 = arith.constant 0 : index
    %14 = vector.load %arg5[%c0_9, %c0_10] : memref<128x128xbf16, #tpu.memory_space<vmem>>, vector<128x128xbf16>
    %cst_11 = arith.constant dense<0.000000e+00> : vector<128x128xf32>
    %15 = tpu.matmul %13, %14, %cst_11 {dimension_numbers = #tpu.dot_dimension_numbers<[1], [0], [0], [1], [0, 0, 1, 1], [], []>} : vector<128x128xbf16>, vector<128x128xbf16>, vector<128x128xf32> -> vector<128x128xf32>
    %16 = vector.broadcast %1 : vector<1x128xf32> to vector<128x128xf32>
    %17 = arith.addf %15, %16 : vector<128x128xf32>
    %cst_12 = arith.constant 0.000000e+00 : f32
    %18 = vector.broadcast %cst_12 : f32 to vector<128x128xf32>
    %19 = arith.maximumf %17, %18 : vector<128x128xf32>
    %20 = arith.truncf %19 : vector<128x128xf32> to vector<128x128xbf16>
    %c0_13 = arith.constant 0 : index
    %c0_14 = arith.constant 0 : index
    %21 = vector.load %arg6[%c0_13, %c0_14] : memref<128x128xbf16, #tpu.memory_space<vmem>>, vector<128x128xbf16>
    %cst_15 = arith.constant dense<0.000000e+00> : vector<128x128xf32>
    %22 = tpu.matmul %20, %21, %cst_15 {dimension_numbers = #tpu.dot_dimension_numbers<[1], [0], [0], [1], [0, 0, 1, 1], [], []>} : vector<128x128xbf16>, vector<128x128xbf16>, vector<128x128xf32> -> vector<128x128xf32>
    %23 = vector.broadcast %2 : vector<1x128xf32> to vector<128x128xf32>
    %24 = arith.addf %22, %23 : vector<128x128xf32>
    %25 = tpu.iota {dimensions = array<i32: 0>} : vector<8x128xi32>
    %c0_16 = arith.constant 0 : index
    %c0_17 = arith.constant 0 : index
    %26 = vector.load %arg3[%c0_16, %c0_17] : memref<1x128xi32, #tpu.memory_space<vmem>>, vector<1x128xi32>
    %27 = vector.broadcast %26 : vector<1x128xi32> to vector<8x128xi32>
    %28 = arith.cmpi eq, %25, %27 : vector<8x128xi32>
    %29 = arith.extui %28 : vector<8x128xi1> to vector<8x128xi32>
    %30 = arith.sitofp %29 : vector<8x128xi32> to vector<8x128xf32>
    %31 = arith.truncf %30 : vector<8x128xf32> to vector<8x128xbf16>
    %c0_18 = arith.constant 0 : index
    %c0_19 = arith.constant 0 : index
    %32 = vector.load %arg8[%c0_18, %c0_19] : memref<8x128xf32, #tpu.memory_space<vmem>>, vector<8x128xf32>
    %33 = arith.truncf %24 : vector<128x128xf32> to vector<128x128xbf16>
    %cst_20 = arith.constant dense<0.000000e+00> : vector<8x128xf32>
    %34 = tpu.matmul %31, %33, %cst_20 {dimension_numbers = #tpu.dot_dimension_numbers<[1], [0], [0], [1], [0, 0, 1, 1], [], []>} : vector<8x128xbf16>, vector<128x128xbf16>, vector<8x128xf32> -> vector<8x128xf32>
    %35 = arith.addf %32, %34 : vector<8x128xf32>
    %c0_21 = arith.constant 0 : index
    %c0_22 = arith.constant 0 : index
    %36 = vector.load %arg8[%c0_21, %c0_22] : memref<8x128xf32, #tpu.memory_space<vmem>>, vector<8x128xf32>
    tpu.vector_store %arg8[%c0_21, %c0_22], %35 {strides = array<i32>} : memref<8x128xf32, #tpu.memory_space<vmem>>, vector<8x128xf32>,
    return
  }
  func.func @transform_0(%arg0: i32, %arg1: i32) -> (i32, i32) {
    %c1_i32 = arith.constant 1 : i32
    %0 = arith.muli %arg0, %c1_i32 : i32
    %1 = arith.addi %0, %arg1 : i32
    %c0_i32 = arith.constant 0 : i32
    %c0_i32_0 = arith.constant 0 : i32
    return %1, %c0_i32 : i32, i32
  }
  func.func @transform_1(%arg0: i32, %arg1: i32) -> (i32, i32) {
    %c1_i32 = arith.constant 1 : i32
    %0 = arith.muli %arg0, %c1_i32 : i32
    %1 = arith.addi %0, %arg1 : i32
    %c0_i32 = arith.constant 0 : i32
    %c0_i32_0 = arith.constant 0 : i32
    return %c0_i32, %1 : i32, i32
  }
  func.func @transform_2(%arg0: i32, %arg1: i32) -> (i32, i32) {
    %c0_i32 = arith.constant 0 : i32
    %c0_i32_0 = arith.constant 0 : i32
    %c0_i32_1 = arith.constant 0 : i32
    return %c0_i32, %c0_i32_0 : i32, i32
  }
  func.func @transform_3(%arg0: i32, %arg1: i32) -> (i32, i32) {
    %c0_i32 = arith.constant 0 : i32
    %c0_i32_0 = arith.constant 0 : i32
    %c0_i32_1 = arith.constant 0 : i32
    return %c0_i32, %c0_i32_0 : i32, i32
  }
  func.func @transform_4(%arg0: i32, %arg1: i32) -> (i32, i32) {
    %c0_i32 = arith.constant 0 : i32
    %c0_i32_0 = arith.constant 0 : i32
    %c0_i32_1 = arith.constant 0 : i32
    return %c0_i32, %c0_i32_0 : i32, i32
  }
  func.func @transform_5(%arg0: i32, %arg1: i32) -> (i32, i32) {
    %c0_i32 = arith.constant 0 : i32
    %c0_i32_0 = arith.constant 0 : i32
    %c0_i32_1 = arith.constant 0 : i32
    return %c0_i32, %c0_i32_0 : i32, i32
  }
  func.func @transform_6(%arg0: i32, %arg1: i32) -> (i32, i32) {
    %c0_i32 = arith.constant 0 : i32
    %c0_i32_0 = arith.constant 0 : i32
    return %arg0, %c0_i32 : i32, i32
  }
}

</mosaic_0001>

<bundles_post_ra>
// kernel: tpu_custom_call.1
= control target key start
LH: loop header
LB: loop body
LE: loop exit
PB: predicated region body
PF: predicated region fallthrough
CT: control target
= control target key end

     0   :  { %11 = vsyncpa [#allocation3], 0  ;;  %s1312_s0 = inlined_call_operand.hbm [shape: bf16[128,128], index: 0, kind: input, shape index: {}]   ;;  %s1313_s1 = inlined_call_operand.vmem [shape: s32[1,128], index: 1, kind: input, shape index: {}]   ;;  %s1314_s2 = inlined_call_operand.hbm [shape: bf16[128,128], index: 2, kind: input, shape index: {}]   ;;  %s1315_s3 = inlined_call_operand.hbm [shape: bf16[128,128], index: 3, kind: input, shape index: {}]   ;;  %s1316_s4 = inlined_call_operand.hbm [shape: bf16[128,128], index: 4, kind: input, shape index: {}]   ;;  %s1317_s5 = inlined_call_operand.vmem [shape: f32[8,128], index: 5, kind: input, shape index: {}]   ;;  %s1318_s6 = inlined_call_operand.hbm [shape: f32[8,128], index: 6, kind: output, shape index: {}]  }
   0x1   :  { %12 = vsyncpa [#allocation6], 0 }
   0x2   :  { %13 = vsyncpa [#allocation9], 0 }
   0x3   :  { %14 = vsyncpa [#allocation4], 0  ;;  %s1169_s21 = smov [#allocation5]   ;;  %s1170_s23 = smov [#allocation2]  }
   0x4   :  { %s43_s22 = sshll.u32 %s1169_s21, 4  ;;  %s24_s24 = sshll.u32 %s1170_s23, 4  ;;  %s44_s22 = int_to_ptr.vmem [resolvable:$true] %s43_s22  ;;  %s1214_s24 = int_to_ptr.vmem [resolvable:$true] %s24_s24 }
   0x5   :  { %s1051_s27 = scalar_lea.hbm %s1314_s2, 1024 }
   0x6   :  { %p1052_p0 = scmp.ne.s32.totalorder %s1314_s2, %s1051_s27  ;;  %p1055_p1 = scmp.lt.u32.totalorder %s1051_s27, %s1314_s2 }
   0x8   :  { %p1057_p2 = pnand %p1055_p1, %p1052_p0 }
   0xa   :  { %1060 = shalt.err (!%p1057_p2)
}
   0xb   :  { %s1061_s8 = scalar_lea.vmem %s44_s22, 1024  ;;  %p1066_p4 = scmp.lt.s32.totalorder %s44_s22, %s44_s22 }
   0xc   :  { %p1062_p3 = scmp.ne.s32.totalorder %s44_s22, %s1061_s8  ;;  %p1067_p5 = scmp.lt.s32.totalorder %s1061_s8, %s1061_s8 }
   0xe   :  { %p1068_p6 = por %p1067_p5, %p1066_p4 }
  0x10   :  { %p1069_p7 = pnand %p1068_p6, %p1062_p3 }
  0x12   :  { %1072 = shalt.err (!%p1069_p7)
}
  0x13   :  { %s1171_s9 = smov 64   ;;  %s1172_s10 = smov 4  }
  0x14   :  { %49 = dma.hbm_to_vmem [thread:$0]  %s1314_s2, 1024, %s44_s22, [#allocation6], %s1171_s9, %s1171_s9, %s1172_s10  }
  0x15   :  { %s1073_s15 = scalar_lea.hbm %s1312_s0, 1024 }
  0x16   :  { %p1074_p8 = scmp.ne.s32.totalorder %s1312_s0, %s1073_s15  ;;  %p1077_p9 = scmp.lt.u32.totalorder %s1073_s15, %s1312_s0 }
  0x18   :  { %p1079_p10 = pnand %p1077_p9, %p1074_p8 }
  0x1a   :  { %1082 = shalt.err (!%p1079_p10)
}
  0x1b   :  { %s1083_s20 = scalar_lea.vmem %s1214_s24, 1024  ;;  %p1088_p12 = scmp.lt.s32.totalorder %s1214_s24, %s1214_s24 }
  0x1c   :  { %p1084_p11 = scmp.ne.s32.totalorder %s1214_s24, %s1083_s20  ;;  %p1089_p13 = scmp.lt.s32.totalorder %s1083_s20, %s1083_s20 }
  0x1e   :  { %p1090_p0 = por %p1089_p13, %p1088_p12 }
  0x20   :  { %p1091_p1 = pnand %p1090_p0, %p1084_p11 }
  0x22   :  { %1094 = shalt.err (!%p1091_p1)
}
  0x23   :  { %30 = dma.hbm_to_vmem [thread:$0]  %s1312_s0, 1024, %s1214_s24, [#allocation3], %s1171_s9, %s1171_s9, %s1172_s10  }
  0x24   :  { %s1173_s22 = smov [#allocation7]   ;;  %s1174_s25 = smov [#allocation8]  }
  0x25   :  { %s55_s23 = sshll.u32 %s1173_s22, 4  ;;  %s67_s26 = sshll.u32 %s1174_s25, 4  ;;  %s56_s23 = int_to_ptr.vmem [resolvable:$true] %s55_s23  ;;  %s1251_s26 = int_to_ptr.vmem [resolvable:$true] %s67_s26 }
  0x26   :  { %s1095_s29 = scalar_lea.hbm %s1315_s3, 1024 }
  0x27   :  { %p1096_p2 = scmp.ne.s32.totalorder %s1315_s3, %s1095_s29  ;;  %p1099_p3 = scmp.lt.u32.totalorder %s1095_s29, %s1315_s3 }
  0x29   :  { %p1101_p4 = pnand %p1099_p3, %p1096_p2 }
  0x2b   :  { %1104 = shalt.err (!%p1101_p4)
}
  0x2c   :  { %s1105_s0 = scalar_lea.vmem %s56_s23, 1024  ;;  %p1110_p6 = scmp.lt.s32.totalorder %s56_s23, %s56_s23 }
  0x2d   :  { %p1106_p5 = scmp.ne.s32.totalorder %s56_s23, %s1105_s0  ;;  %p1111_p7 = scmp.lt.s32.totalorder %s1105_s0, %s1105_s0 }
  0x2f   :  { %p1112_p8 = por %p1111_p7, %p1110_p6 }
  0x31   :  { %p1113_p9 = pnand %p1112_p8, %p1106_p5 }
  0x33   :  { %1116 = shalt.err (!%p1113_p9)
}
  0x34   :  { %61 = dma.hbm_to_vmem [thread:$0]  %s1315_s3, 1024, %s56_s23, [#allocation6], %s1171_s9, %s1171_s9, %s1172_s10  }
  0x35   :  { %s1117_s15 = scalar_lea.hbm %s1316_s4, 1024 }
  0x36   :  { %p1118_p10 = scmp.ne.s32.totalorder %s1316_s4, %s1117_s15  ;;  %p1121_p11 = scmp.lt.u32.totalorder %s1117_s15, %s1316_s4 }
  0x38   :  { %p1123_p12 = pnand %p1121_p11, %p1118_p10 }
  0x3a   :  { %1126 = shalt.err (!%p1123_p12)
}
  0x3b   :  { %s1127_s20 = scalar_lea.vmem %s1251_s26, 1024  ;;  %p1132_p0 = scmp.lt.s32.totalorder %s1251_s26, %s1251_s26 }
  0x3c   :  { %p1128_p13 = scmp.ne.s32.totalorder %s1251_s26, %s1127_s20  ;;  %p1133_p1 = scmp.lt.s32.totalorder %s1127_s20, %s1127_s20 }
  0x3e   :  { %p1134_p2 = por %p1133_p1, %p1132_p0 }
  0x40   :  { %p1135_p3 = pnand %p1134_p2, %p1128_p13 }
  0x42   :  { %1138 = shalt.err (!%p1135_p3)
}
  0x43   :  { %73 = dma.hbm_to_vmem [thread:$0]  %s1316_s4, 1024, %s1251_s26, [#allocation9], %s1171_s9, %s1171_s9, %s1172_s10  }
  0x44   :  { %1161 = dma.done.wait [#allocation3], 1024  }
  0x45   :  { %1162 = vsyncadd [#allocation3], 4294966272 }
  0x46   :  { %1163 = dma.done.wait [#allocation6], 2048  }
  0x47   :  { %1164 = vsyncadd [#allocation6], 4294965248 }
  0x48   :  { %1165 = dma.done.wait [#allocation9], 1024  }
  0x49   :  { %1166 = vsyncadd [#allocation9], 4294966272  ;;  %v1019_v0 = vld [vmem:[#allocation5] sm:$0xff]   ;;  %v1020_v1 = vld [vmem:[#allocation5 + $0x8] sm:$0xff]   ;;  %vm1176_vm0 = vmmov 0   ;;  %s1178_s26 = smov [#allocation10]  }
  0x4a   :  { %893 = vmatprep.subr.bf16.mxu0 %v1019_v0  ;;  %v1021_v2 = vld [vmem:[#allocation5 + $0x10] sm:$0xff]   ;;  %v1022_v3 = vld [vmem:[#allocation5 + $0x18] sm:$0xff]   ;;  %v1027_v4 = vld [vmem:[#allocation2] sm:$0xff]   ;;  %s783_s27 = sshll.u32 %s1178_s26, 4  ;;  %s784_s27 = int_to_ptr.vmem [resolvable:$true] %s783_s27 }
  0x4b   :  { %894 = vmatpush3.bf16.msra.mxu0 %v1019_v0  ;;  %909 = vmatprep.mubr.bf16.mxu0 %v1027_v4  ;;  %v1023_v5 = vld [vmem:[#allocation5 + $0x20] sm:$0xff]   ;;  %v1024_v6 = vld [vmem:[#allocation5 + $0x28] sm:$0xff]   ;;  %v1025_v9 = vld [vmem:[#allocation5 + $0x30] sm:$0xff]   ;;  %s1139_s28 = scalar_lea.vmem %s784_s27, 128  ;;  %p1144_p5 = scmp.lt.s32.totalorder %s784_s27, %s784_s27 }
  0x4c   :  { %895 = vmatprep.subr.bf16.mxu0 %v1020_v1  ;;  %v1035_v7 = vld [vmem:[#allocation7] sm:$0xff]   ;;  %v1036_v8 = vld [vmem:[#allocation7 + $0x8] sm:$0xff]   ;;  %v1037_v10 = vld [vmem:[#allocation7 + $0x10] sm:$0xff]   ;;  %p1140_p4 = scmp.ne.s32.totalorder %s784_s27, %s1139_s28  ;;  %p1145_p6 = scmp.lt.s32.totalorder %s1139_s28, %s1139_s28 }
  0x4d   :  { %925 = vmatprep.subr.bf16.mxu1 %v1035_v7  ;;  %v1026_v11 = vld [vmem:[#allocation5 + $0x38] sm:$0xff]   ;;  %v1039_v13 = vld [vmem:[#allocation7 + $0x20] sm:$0xff]   ;;  %v1028_v14 = vld [vmem:[#allocation2 + $0x8] sm:$0xff]  }
  0x4e   :  { %926 = vmatpush3.bf16.msra.mxu1 %v1035_v7  ;;  %v1038_v12 = vld [vmem:[#allocation7 + $0x18] sm:$0xff]   ;;  %v1029_v15 = vld [vmem:[#allocation2 + $0x10] sm:$0xff]   ;;  %v1040_v16 = vld [vmem:[#allocation7 + $0x28] sm:$0xff]   ;;  %p1146_p7 = por %p1145_p6, %p1144_p5 }
  0x4f   :  { %896 = vmatpush3.bf16.msra.mxu0 %v1020_v1  ;;  %927 = vmatprep.subr.bf16.mxu1 %v1036_v8  ;;  %v1030_v17 = vld [vmem:[#allocation2 + $0x18] sm:$0xff]   ;;  %v1031_v18 = vld [vmem:[#allocation2 + $0x20] sm:$0xff]   ;;  %v1032_v19 = vld [vmem:[#allocation2 + $0x28] sm:$0xff]  }
  0x50   :  { %897 = vmatprep.subr.bf16.mxu0 %v1021_v2  ;;  %v1033_v20 = vld [vmem:[#allocation2 + $0x30] sm:$0xff]   ;;  %v1034_v21 = vld [vmem:[#allocation2 + $0x38] sm:$0xff]   ;;  %v1043_v24 = vld [vmem:[#allocation8] sm:$0xff]   ;;  %p1147_p8 = pnand %p1146_p7, %p1140_p4 }
  0x51   :  { %v1041_v22 = vld [vmem:[#allocation7 + $0x30] sm:$0xff]   ;;  %v1042_v23 = vld [vmem:[#allocation7 + $0x38] sm:$0xff]   ;;  %v1044_v25 = vld [vmem:[#allocation8 + $0x8] sm:$0xff]  }
  0x52   :  { %928 = vmatpush3.bf16.msra.mxu1 %v1036_v8  ;;  %v1045_v26 = vld [vmem:[#allocation8 + $0x10] sm:$0xff]   ;;  %v1046_v27 = vld [vmem:[#allocation8 + $0x18] sm:$0xff]   ;;  %v1047_v28 = vld [vmem:[#allocation8 + $0x20] sm:$0xff]  }
  0x53   :  { %898 = vmatpush3.bf16.msra.mxu0 %v1021_v2  ;;  %929 = vmatprep.subr.bf16.mxu1 %v1037_v10  ;;  %v1048_v29 = vld [vmem:[#allocation8 + $0x28] sm:$0xff]   ;;  %v797_v30 = vld [vmem:[%s1317_s5] ss:$0 sm:$0xff] }
  0x54   :  { %899 = vmatprep.subr.bf16.mxu0 %v1022_v3 }
  0x56   :  { %930 = vmatpush3.bf16.msra.mxu1 %v1037_v10 }
  0x57   :  { %900 = vmatpush3.bf16.msra.mxu0 %v1022_v3  ;;  %931 = vmatprep.subr.bf16.mxu1 %v1038_v12 }
  0x58   :  { %901 = vmatprep.subr.bf16.mxu0 %v1023_v5 }
  0x5a   :  { %932 = vmatpush3.bf16.msra.mxu1 %v1038_v12 }
  0x5b   :  { %902 = vmatpush3.bf16.msra.mxu0 %v1023_v5  ;;  %933 = vmatprep.subr.bf16.mxu1 %v1039_v13 }
  0x5c   :  { %903 = vmatprep.subr.bf16.mxu0 %v1024_v6 }
  0x5e   :  { %934 = vmatpush3.bf16.msra.mxu1 %v1039_v13 }
  0x5f   :  { %904 = vmatpush3.bf16.msra.mxu0 %v1024_v6  ;;  %935 = vmatprep.subr.bf16.mxu1 %v1040_v16 }
  0x60   :  { %905 = vmatprep.subr.bf16.mxu0 %v1025_v9 }
  0x62   :  { %936 = vmatpush3.bf16.msra.mxu1 %v1040_v16 }
  0x63   :  { %906 = vmatpush3.bf16.msra.mxu0 %v1025_v9  ;;  %937 = vmatprep.subr.bf16.mxu1 %v1041_v22 }
  0x64   :  { %907 = vmatprep.subr.bf16.mxu0 %v1026_v11 }
  0x66   :  { %938 = vmatpush3.bf16.msra.mxu1 %v1041_v22 }
  0x67   :  { %908 = vmatpush3.bf16.msra.mxu0 %v1026_v11  ;;  %939 = vmatprep.subr.bf16.mxu1 %v1042_v23 }
  0x68   :  { %957 = vmatprep.subr.bf16.mxu0 %v1043_v24 }
  0x6a   :  { %910 = vmatmul.mubr.bf16.vlgmr.msra.gmra.mrb[0].mxu0 %v1028_v14  ;;  %940 = vmatpush3.bf16.msra.mxu1 %v1042_v23  ;;  %v1049_v23 = vld [vmem:[#allocation8 + $0x30] sm:$0xff]  }
  0x6b   :  { %913 = vmatprep.mubr.bf16.mxu0 %v1029_v15  ;;  %958 = vmatpush3.bf16.msra.mxu0 %v1043_v24  ;;  %v1050_v24 = vld [vmem:[#allocation8 + $0x38] sm:$0xff]  }
  0x6c   :  { %959 = vmatprep.subr.bf16.mxu0 %v1044_v25 }
  0x6f   :  { %960 = vmatpush3.bf16.msra.mxu0 %v1044_v25  ;;  %v814_v25 = vld [vmem:[%s1317_s5 + $0x1] ss:$0 sm:$0xff] }
  0x70   :  { %961 = vmatprep.subr.bf16.mxu0 %v1045_v26 }
  0x72   :  { %914 = vmatmul.mubr.bf16.gmra.mrb[4].mxu0 %v1030_v17 }
  0x73   :  { %917 = vmatprep.mubr.bf16.mxu0 %v1031_v18  ;;  %962 = vmatpush3.bf16.msra.mxu0 %v1045_v26 }
  0x74   :  { %963 = vmatprep.subr.bf16.mxu0 %v1046_v27 }
  0x77   :  { %964 = vmatpush3.bf16.msra.mxu0 %v1046_v27 }
  0x78   :  { %965 = vmatprep.subr.bf16.mxu0 %v1047_v28 }
  0x7a   :  { %918 = vmatmul.mubr.bf16.gmra.mrb[8].mxu0 %v1032_v19 }
  0x7b   :  { %921 = vmatprep.mubr.bf16.mxu0 %v1033_v20  ;;  %966 = vmatpush3.bf16.msra.mxu0 %v1047_v28 }
  0x7c   :  { %967 = vmatprep.subr.bf16.mxu0 %v1048_v29 }
  0x7f   :  { %968 = vmatpush3.bf16.msra.mxu0 %v1048_v29 }
  0x80   :  { %969 = vmatprep.subr.bf16.mxu0 %v1049_v23 }
  0x82   :  { %922 = vmatmul.mubr.bf16.gmra.mrb[12].mxu0 %v1034_v21 }
  0x83   :  { %970 = vmatpush3.bf16.msra.mxu0 %v1049_v23 }
  0x84   :  { %971 = vmatprep.subr.bf16.mxu0 %v1050_v24 }
  0x87   :  { %972 = vmatpush3.bf16.msra.mxu0 %v1050_v24 }
 0x13d   :  { %v911_v31 = vpop.f32.mrb[0].mxu0 }
 0x13e   :  { %v283_v32 = vadd.f32 %v911_v31, %v797_v30  ;;  %v274_v33 = vpop.f32.mrb[1].mxu0 }
 0x13f   :  { %v275_v34 = vadd.f32 %v797_v30, %v274_v33  ;;  %v912_v35 = vpop.f32.mrb[2].mxu0 }
 0x140   :  { %v286_v36 = vadd.f32 %v912_v35, %v797_v30  ;;  %v277_v37 = vpop.f32.mrb[3].mxu0  ;;  %v339_v39 = vmax.f32 %v283_v32, 0.0 }
 0x141   :  { %v278_v38 = vadd.f32 %v797_v30, %v277_v37  ;;  %v337_v41 = vmax.f32 %v275_v34, 0.0 }
 0x142   :  { %v340_v40 = vmax.f32 %v286_v36, 0.0 }
 0x143   :  { %v338_v42 = vmax.f32 %v278_v38, 0.0 }
 0x144   :  { %v354_v43 = vpack.c.bf16 %v340_v40, %v339_v39 }
 0x145   :  { %v915_v44 = vpop.f32.mrb[4].mxu0  ;;  %v353_v45 = vpack.c.bf16 %v338_v42, %v337_v41 }
 0x146   :  { %v299_v46 = vadd.f32 %v915_v44, %v797_v30  ;;  %v290_v47 = vpop.f32.mrb[5].mxu0 }
 0x147   :  { %v291_v48 = vadd.f32 %v797_v30, %v290_v47  ;;  %v916_v49 = vpop.f32.mrb[6].mxu0  ;;  %941 = vmatprep.mubr.bf16.mxu1 %v353_v45 }
 0x148   :  { %v302_v50 = vadd.f32 %v916_v49, %v797_v30  ;;  %v293_v51 = vpop.f32.mrb[7].mxu0  ;;  %942 = vmatmul.mubr.bf16.vlgmr.msra.gmra.mrb[0].mxu1 %v354_v43  ;;  %v343_v53 = vmax.f32 %v299_v46, 0.0 }
 0x149   :  { %v294_v52 = vadd.f32 %v797_v30, %v293_v51  ;;  %v341_v55 = vmax.f32 %v291_v48, 0.0 }
 0x14a   :  { %v344_v54 = vmax.f32 %v302_v50, 0.0 }
 0x14b   :  { %v342_v56 = vmax.f32 %v294_v52, 0.0 }
 0x14c   :  { %v356_v57 = vpack.c.bf16 %v344_v54, %v343_v53 }
 0x14d   :  { %v355_v58 = vpack.c.bf16 %v342_v56, %v341_v55  ;;  %v919_v59 = vpop.f32.mrb[8].mxu0 }
 0x14e   :  { %v315_v60 = vadd.f32 %v919_v59, %v797_v30  ;;  %v306_v61 = vpop.f32.mrb[9].mxu0 }
 0x14f   :  { %v307_v62 = vadd.f32 %v797_v30, %v306_v61  ;;  %v920_v63 = vpop.f32.mrb[10].mxu0  ;;  %945 = vmatprep.mubr.bf16.mxu1 %v355_v58 }
 0x150   :  { %v318_v0 = vadd.f32 %v920_v63, %v797_v30  ;;  %v309_v1 = vpop.f32.mrb[11].mxu0  ;;  %946 = vmatmul.mubr.bf16.gmra.mrb[4].mxu1 %v356_v57  ;;  %v347_v3 = vmax.f32 %v315_v60, 0.0 }
 0x151   :  { %v310_v2 = vadd.f32 %v797_v30, %v309_v1  ;;  %v345_v5 = vmax.f32 %v307_v62, 0.0 }
 0x152   :  { %v348_v4 = vmax.f32 %v318_v0, 0.0 }
 0x153   :  { %v346_v6 = vmax.f32 %v310_v2, 0.0 }
 0x154   :  { %v358_v7 = vpack.c.bf16 %v348_v4, %v347_v3 }
 0x155   :  { %v357_v8 = vpack.c.bf16 %v346_v6, %v345_v5  ;;  %v923_v9 = vpop.f32.mrb[12].mxu0 }
 0x156   :  { %v331_v10 = vadd.f32 %v923_v9, %v797_v30  ;;  %v322_v11 = vpop.f32.mrb[13].mxu0 }
 0x157   :  { %v323_v12 = vadd.f32 %v797_v30, %v322_v11  ;;  %v924_v13 = vpop.f32.mrb[14].mxu0  ;;  %949 = vmatprep.mubr.bf16.mxu1 %v357_v8 }
 0x158   :  { %v334_v14 = vadd.f32 %v924_v13, %v797_v30  ;;  %v325_v15 = vpop.f32.mrb[15].mxu0  ;;  %950 = vmatmul.mubr.bf16.gmra.mrb[8].mxu1 %v358_v7  ;;  %v351_v17 = vmax.f32 %v331_v10, 0.0 }
 0x159   :  { %v326_v16 = vadd.f32 %v797_v30, %v325_v15  ;;  %v349_v19 = vmax.f32 %v323_v12, 0.0 }
 0x15a   :  { %v352_v18 = vmax.f32 %v334_v14, 0.0 }
 0x15b   :  { %v350_v20 = vmax.f32 %v326_v16, 0.0 }
 0x15c   :  { %v360_v21 = vpack.c.bf16 %v352_v18, %v351_v17  ;;  %v1175_v18 = vmov 0.0  }
 0x15d   :  { %v359_v22 = vpack.c.bf16 %v350_v20, %v349_v19  ;;  %989 = vmatprep.subr.bf16.mxu1 %v1175_v18  ;;  %v823_v20 = vld [vmem:[%s1317_s5 + $0x2] ss:$0 sm:$0xff] }
 0x15f   :  { %953 = vmatprep.mubr.bf16.mxu1 %v359_v22 }
 0x160   :  { %954 = vmatmul.mubr.bf16.gmra.mrb[12].mxu1 %v360_v21 }
 0x161   :  { %1005 = vmatprep.mubr.msk.bf16.mxu1 %vm1176_vm0, %v1175_v18 }
 0x21b   :  { %v943_v26 = vpop.f32.mrb[0].mxu1 }
 0x21c   :  { %v472_v27 = vadd.f32 %v943_v26, %v814_v25  ;;  %v463_v28 = vpop.f32.mrb[1].mxu1 }
 0x21d   :  { %v464_v29 = vadd.f32 %v814_v25, %v463_v28  ;;  %v944_v30 = vpop.f32.mrb[2].mxu1 }
 0x21e   :  { %v475_v31 = vadd.f32 %v944_v30, %v814_v25  ;;  %v466_v32 = vpop.f32.mrb[3].mxu1  ;;  %v528_v34 = vmax.f32 %v472_v27, 0.0 }
 0x21f   :  { %v467_v33 = vadd.f32 %v814_v25, %v466_v32  ;;  %v526_v36 = vmax.f32 %v464_v29, 0.0 }
 0x220   :  { %v529_v35 = vmax.f32 %v475_v31, 0.0 }
 0x221   :  { %v527_v37 = vmax.f32 %v467_v33, 0.0 }
 0x222   :  { %v543_v38 = vpack.c.bf16 %v529_v35, %v528_v34 }
 0x223   :  { %v542_v39 = vpack.c.bf16 %v527_v37, %v526_v36  ;;  %v947_v40 = vpop.f32.mrb[4].mxu1 }
 0x224   :  { %v488_v41 = vadd.f32 %v947_v40, %v814_v25  ;;  %v479_v42 = vpop.f32.mrb[5].mxu1 }
 0x225   :  { %v480_v43 = vadd.f32 %v814_v25, %v479_v42  ;;  %v948_v44 = vpop.f32.mrb[6].mxu1  ;;  %973 = vmatprep.mubr.bf16.mxu0 %v542_v39 }
 0x226   :  { %v491_v45 = vadd.f32 %v948_v44, %v814_v25  ;;  %v482_v46 = vpop.f32.mrb[7].mxu1  ;;  %974 = vmatmul.mubr.bf16.vlgmr.msra.gmra.mrb[16].mxu0 %v543_v38  ;;  %v532_v48 = vmax.f32 %v488_v41, 0.0 }
 0x227   :  { %v483_v47 = vadd.f32 %v814_v25, %v482_v46  ;;  %v530_v50 = vmax.f32 %v480_v43, 0.0 }
 0x228   :  { %v533_v49 = vmax.f32 %v491_v45, 0.0 }
 0x229   :  { %v531_v51 = vmax.f32 %v483_v47, 0.0 }
 0x22a   :  { %v545_v52 = vpack.c.bf16 %v533_v49, %v532_v48 }
 0x22b   :  { %v544_v53 = vpack.c.bf16 %v531_v51, %v530_v50  ;;  %v951_v54 = vpop.f32.mrb[8].mxu1 }
 0x22c   :  { %v504_v55 = vadd.f32 %v951_v54, %v814_v25  ;;  %v495_v56 = vpop.f32.mrb[9].mxu1 }
 0x22d   :  { %v496_v57 = vadd.f32 %v814_v25, %v495_v56  ;;  %v952_v58 = vpop.f32.mrb[10].mxu1  ;;  %977 = vmatprep.mubr.bf16.mxu0 %v544_v53 }
 0x22e   :  { %v507_v59 = vadd.f32 %v952_v58, %v814_v25  ;;  %v498_v60 = vpop.f32.mrb[11].mxu1  ;;  %978 = vmatmul.mubr.bf16.gmra.mrb[20].mxu0 %v545_v52  ;;  %v536_v62 = vmax.f32 %v504_v55, 0.0  ;;  %v715_v52 = vlaneseq }
 0x22f   :  { %v499_v61 = vadd.f32 %v814_v25, %v498_v60  ;;  %v534_v0 = vmax.f32 %v496_v57, 0.0 }
 0x230   :  { %v537_v63 = vmax.f32 %v507_v59, 0.0  ;;  %v716_v60 = vshrl.u32 %v715_v52, 7 }
 0x231   :  { %v535_v1 = vmax.f32 %v499_v61, 0.0 }
 0x232   :  { %v547_v2 = vpack.c.bf16 %v537_v63, %v536_v62  ;;  %v832_v62 = vld [vmem:[%s1313_s1] ss:$0 sm:$0xff]  ;;  %v1177_v63 = vmov 1.0|1.0  }
 0x233   :  { %v546_v3 = vpack.c.bf16 %v535_v1, %v534_v0  ;;  %v955_v4 = vpop.f32.mrb[12].mxu1  ;;  %vm722_vm1 = vcmp.eq.s32.totalorder %v716_v60, %v832_v62 }
 0x234   :  { %v520_v5 = vadd.f32 %v955_v4, %v814_v25  ;;  %v511_v6 = vpop.f32.mrb[13].mxu1  ;;  %vm834_vm2 = vmpackc.low %vm722_vm1, %vm722_vm1 }
 0x235   :  { %v512_v7 = vadd.f32 %v814_v25, %v511_v6  ;;  %v956_v8 = vpop.f32.mrb[14].mxu1  ;;  %981 = vmatprep.mubr.bf16.mxu0 %v546_v3 }
 0x236   :  { %v523_v9 = vadd.f32 %v956_v8, %v814_v25  ;;  %v514_v10 = vpop.f32.mrb[15].mxu1  ;;  %982 = vmatmul.mubr.bf16.gmra.mrb[24].mxu0 %v547_v2  ;;  %v540_v12 = vmax.f32 %v520_v5, 0.0 }
 0x237   :  { %v515_v11 = vadd.f32 %v814_v25, %v514_v10  ;;  %v538_v14 = vmax.f32 %v512_v7, 0.0 }
 0x238   :  { %v541_v13 = vmax.f32 %v523_v9, 0.0 }
 0x239   :  { %v539_v15 = vmax.f32 %v515_v11, 0.0 }
 0x23a   :  { %v549_v16 = vpack.c.bf16 %v541_v13, %v540_v12 }
 0x23b   :  { %v548_v17 = vpack.c.bf16 %v539_v15, %v538_v14 }
 0x23d   :  { %985 = vmatprep.mubr.bf16.mxu0 %v548_v17 }
 0x23e   :  { %986 = vmatmul.mubr.bf16.gmra.mrb[28].mxu0 %v549_v16 }
 0x2f9   :  { %v975_v19 = vpop.f32.mrb[16].mxu0 }
 0x2fa   :  { %v652_v21 = vpop.f32.mrb[17].mxu0  ;;  %v661_v23 = vadd.f32 %v975_v19, %v823_v20 }
 0x2fb   :  { %v976_v22 = vpop.f32.mrb[18].mxu0  ;;  %v653_v26 = vadd.f32 %v823_v20, %v652_v21 }
 0x2fc   :  { %v664_v24 = vadd.f32 %v976_v22, %v823_v20  ;;  %v655_v25 = vpop.f32.mrb[19].mxu0 }
 0x2fd   :  { %v656_v27 = vadd.f32 %v823_v20, %v655_v25 }
 0x2fe   :  { %v728_v28 = vpack.c.bf16 %v664_v24, %v661_v23 }
 0x2ff   :  { %v727_v29 = vpack.c.bf16 %v656_v27, %v653_v26 }
 0x301   :  { %v979_v30 = vpop.f32.mrb[20].mxu0  ;;  %990 = vmatpush3.bf16.msra.mxu1 %v727_v29 }
 0x302   :  { %v668_v31 = vpop.f32.mrb[21].mxu0  ;;  %991 = vmatprep.subr.bf16.mxu1 %v1175_v18  ;;  %v677_v33 = vadd.f32 %v979_v30, %v823_v20 }
 0x303   :  { %v980_v32 = vpop.f32.mrb[22].mxu0  ;;  %v669_v36 = vadd.f32 %v823_v20, %v668_v31 }
 0x304   :  { %v680_v34 = vadd.f32 %v980_v32, %v823_v20  ;;  %v671_v35 = vpop.f32.mrb[23].mxu0 }
 0x305   :  { %v672_v37 = vadd.f32 %v823_v20, %v671_v35  ;;  %992 = vmatpush3.bf16.msra.mxu1 %v728_v28 }
 0x306   :  { %v730_v38 = vpack.c.bf16 %v680_v34, %v677_v33  ;;  %993 = vmatprep.subr.bf16.mxu1 %v1175_v18 }
 0x307   :  { %v729_v39 = vpack.c.bf16 %v672_v37, %v669_v36 }
 0x309   :  { %v983_v40 = vpop.f32.mrb[24].mxu0  ;;  %994 = vmatpush3.bf16.msra.mxu1 %v729_v39 }
 0x30a   :  { %v684_v41 = vpop.f32.mrb[25].mxu0  ;;  %995 = vmatprep.subr.bf16.mxu1 %v1175_v18  ;;  %v693_v43 = vadd.f32 %v983_v40, %v823_v20 }
 0x30b   :  { %v984_v42 = vpop.f32.mrb[26].mxu0  ;;  %v685_v46 = vadd.f32 %v823_v20, %v684_v41 }
 0x30c   :  { %v696_v44 = vadd.f32 %v984_v42, %v823_v20  ;;  %v687_v45 = vpop.f32.mrb[27].mxu0 }
 0x30d   :  { %v688_v47 = vadd.f32 %v823_v20, %v687_v45  ;;  %996 = vmatpush3.bf16.msra.mxu1 %v730_v38 }
 0x30e   :  { %v732_v48 = vpack.c.bf16 %v696_v44, %v693_v43  ;;  %997 = vmatprep.subr.bf16.mxu1 %v1175_v18 }
 0x30f   :  { %v731_v49 = vpack.c.bf16 %v688_v47, %v685_v46 }
 0x311   :  { %v987_v50 = vpop.f32.mrb[28].mxu0  ;;  %998 = vmatpush3.bf16.msra.mxu1 %v731_v49 }
 0x312   :  { %v700_v51 = vpop.f32.mrb[29].mxu0  ;;  %999 = vmatprep.subr.bf16.mxu1 %v1175_v18  ;;  %v709_v54 = vadd.f32 %v987_v50, %v823_v20 }
 0x313   :  { %v988_v53 = vpop.f32.mrb[30].mxu0  ;;  %v701_v57 = vadd.f32 %v823_v20, %v700_v51 }
 0x314   :  { %v712_v55 = vadd.f32 %v988_v53, %v823_v20  ;;  %v703_v56 = vpop.f32.mrb[31].mxu0 }
 0x315   :  { %v704_v58 = vadd.f32 %v823_v20, %v703_v56  ;;  %1000 = vmatpush3.bf16.msra.mxu1 %v732_v48 }
 0x316   :  { %v734_v59 = vpack.c.bf16 %v712_v55, %v709_v54  ;;  %1001 = vmatprep.subr.bf16.mxu1 %v1175_v18 }
 0x317   :  { %v733_v61 = vpack.c.bf16 %v704_v58, %v701_v57 }
 0x319   :  { %1002 = vmatpush3.bf16.msra.mxu1 %v733_v61 }
 0x31a   :  { %1003 = vmatprep.subr.bf16.mxu1 %v1175_v18 }
 0x31d   :  { %1004 = vmatpush3.bf16.msra.mxu1 %v734_v59 }
 0x320   :  { %1006 = vmatmul.mubr.msk.bf16.vlgmr.msra.gmra.mrb[16].mxu1 %vm834_vm2, %v1177_v63 }
 0x3f3   :  { %v769_v0 = vpop.f32.mrb[16].mxu1 }
 0x3f4   :  { %v1007_v1 = vpop.f32.mrb[17].mxu1  ;;  %776 = vst [vmem:[#allocation10] sm:$0xff] %v769_v0 }
 0x3f5   :  { %v772_v2 = vpop.f32.mrb[18].mxu1 }
 0x3f6   :  { %v1008_v3 = vpop.f32.mrb[19].mxu1 }
 0x3f7   :  { %1150 = shalt.err (!%p1147_p8)
}
 0x3f8   :  { %s1151_s30 = scalar_lea.hbm %s1318_s6, 128 }
 0x3f9   :  { %p1152_p9 = scmp.ne.s32.totalorder %s1318_s6, %s1151_s30  ;;  %p1155_p10 = scmp.lt.u32.totalorder %s1151_s30, %s1318_s6 }
 0x3fb   :  { %p1157_p11 = pnand %p1155_p10, %p1152_p9 }
 0x3fd   :  { %1160 = shalt.err (!%p1157_p11)
}
 0x3fe   :  { %786 = dma.vmem_to_hbm [thread:$0]  %s784_s27, 128, %s1318_s6, [#allocation4]  }
 0x3ff   :  { %1167 = dma.done.wait [#allocation4], 128  }
 0x400   :  { %1168 = vsyncadd [#allocation4], 4294967168 }
 0x401   :  { %790 = vsyncpa [#allocation3], 1 }
 0x402   :  { %791 = vsyncpa [#allocation6], 1 }
 0x403   :  { %792 = vsyncpa [#allocation9], 1 }
 0x404   :  { %793 = vsyncpa [#allocation4], 1 }

</bundles_post_ra>
